<compile_context>
chip_gen: v6e
topology: v6e:2x2x1
jax: 0.10.0
libtpu: 0.0.40
codegen_flags: <defaults>
</compile_context>

<pallas_src>
import jax
import jax.numpy as jnp
from jax import lax
from jax.experimental import pallas as pl
from jax.experimental.pallas import tpu as pltpu

_LANES = 128
_SUBLANES = 8
_TILE_BYTES = 1 << 20  # ~1 MiB per input block; x3 inputs x2 buffers = ~6 MiB VMEM


def _round_up(x: int, m: int) -> int:
    return ((x + m - 1) // m) * m


def _cdiv(a: int, b: int) -> int:
    return -(-a // b)


def _make_icp_kernel(tile_rows: int, chunk_rows: int, valid_rows: int):
    """Counts elements strictly inside (lower, upper) as int32 (8,128) partials.

    tile_rows  : rows of the (rows, 128) slab handled per grid step
    chunk_rows : rows processed per fori_loop iteration (multiple of 8,
                 divides tile_rows, aligned with dtype packing)
    valid_rows : rows < valid_rows hold real data or neutral zero padding;
                 rows >= valid_rows (out-of-bounds garbage of a partial last
                 block) are masked out.
    """
    n_chunks = tile_rows // chunk_rows

    def kernel(lower_ref, upper_ref, target_ref, out_ref):
        tile_row0 = pl.program_id(0) * tile_rows
        # Hoisted out of the loop (JAX does not CSE broadcast_in_dim).
        row_iota = lax.broadcasted_iota(jnp.int32, (chunk_rows, _LANES), 0)

        def body(c, acc):
            r0 = pl.multiple_of(c * chunk_rows, chunk_rows)
            lo = lower_ref[pl.ds(r0, chunk_rows), :]
            hi = upper_ref[pl.ds(r0, chunk_rows), :]
            t = target_ref[pl.ds(r0, chunk_rows), :]
            inside = jnp.logical_and(t > lo, t < hi)
            # Row-level validity mask: kills garbage rows of a partial block.
            valid = (tile_row0 + r0 + row_iota) < valid_rows
            cnt = jnp.logical_and(inside, valid).astype(jnp.int32)
            # Fold chunk_rows -> 8 sublanes: whole-vreg adds, no cross-lane work.
            return acc + cnt.reshape(chunk_rows // _SUBLANES, _SUBLANES, _LANES).sum(axis=0)

        acc = lax.fori_loop(
            0, n_chunks, body, jnp.zeros((_SUBLANES, _LANES), jnp.int32))
        out_ref[...] = acc

    return kernel


def icp(preds, target, quantiles=None):
    """preds: (B, T, Q), target: (B, T) -> scalar f32 coverage fraction."""
    del quantiles  # only fixes Q; unused in the forward computation

    B, T, Q = preds.shape
    n_true = B * T

    # Only the two outer quantile planes are ever used.  Slicing both from the
    # same flattened view keeps the producer a single (multi-output) fusion.
    pf = preds.reshape(n_true, Q)
    lower = pf[:, 0]
    upper = pf[:, Q - 1]
    tgt = target.reshape(n_true)

    itemsizes = [jnp.dtype(a.dtype).itemsize for a in (lower, upper, tgt)]
    pack = max(_SUBLANES, 32 // min(itemsizes))  # 8 f32 / 16 bf16 / 32 int8
    max_item = max(itemsizes)

    # Lane-dense (rows, 128) layout.  Pad only to the next 128-lane multiple
    # (nothing when B*T % 128 == 0); tiny inputs are padded to one full
    # (8, 128) tile.  NO tile-multiple padding: the final partial grid block
    # is masked in-kernel.
    rows = max(_cdiv(n_true, _LANES), 1)
    rows_pad = _SUBLANES if rows < _SUBLANES else rows
    padded_len = rows_pad * _LANES

    # Block rows: ~_TILE_BYTES per input block, aligned to the packing factor.
    cap_rows = max(pack, (_TILE_BYTES // (_LANES * max_item)) // pack * pack)
    if rows_pad <= cap_rows:
        # Whole problem fits one block: split in two so the "parallel" grid
        # axis has >=2 steps and both v7x TensorCores stream HBM.
        tile_rows = max(_SUBLANES, _round_up(_cdiv(rows_pad, 2), _SUBLANES))
    else:
        tile_rows = cap_rows
    num_tiles = _cdiv(rows_pad, tile_rows)

    # Chunk processed per in-kernel loop iteration (64 is pack-aligned for
    # f32/bf16/int8; smaller fallbacks only trigger for tiny inputs).
    if tile_rows % 64 == 0:
        chunk_rows = 64
    elif tile_rows % 32 == 0:
        chunk_rows = 32
    elif tile_rows % 16 == 0:
        chunk_rows = 16
    else:
        chunk_rows = _SUBLANES

    def _prep(x):
        pad = padded_len - n_true
        if pad:
            # <=127 elements in general (only tiny inputs pad up to one tile);
            # zero padding is count-neutral (0 > 0 and 0 < 0 are both false).
            x = jnp.pad(x, (0, pad))
        return x.reshape(rows_pad, _LANES)

    lower2, upper2, target2 = _prep(lower), _prep(upper), _prep(tgt)

    in_spec = pl.BlockSpec((tile_rows, _LANES), lambda i: (i, 0))

    partials = pl.pallas_call(
        _make_icp_kernel(tile_rows, chunk_rows, rows_pad),
        out_shape=jax.ShapeDtypeStruct((num_tiles * _SUBLANES, _LANES), jnp.int32),
        grid=(num_tiles,),
        in_specs=[in_spec, in_spec, in_spec],
        out_specs=pl.BlockSpec((_SUBLANES, _LANES), lambda i: (i, 0)),
        compiler_params=pltpu.CompilerParams(
            dimension_semantics=("parallel",),
        ),
    )(lower2, upper2, target2)

    # Tiny epilogue in XLA: exact integer count, then divide by the true N.
    return jnp.sum(partials).astype(jnp.float32) / jnp.float32(n_true)


if __name__ == "__main__":
    # ICP has no learnable parameters; `quantiles` only fixes Q.
    quantiles = [0.1, 0.5, 0.9]
    B, T, Q = 2, 8, len(quantiles)

    key = jax.random.PRNGKey(0)
    kp, kt = jax.random.split(key)
    # Sort along the quantile axis so preds[...,0] <= preds[...,-1] (realistic
    # quantile predictions), though the kernel does not require it.
    preds = jnp.sort(jax.random.normal(kp, (B, T, Q), dtype=jnp.float32), axis=-1)
    target = jax.random.normal(kt, (B, T), dtype=jnp.float32)

    # jit the wrapper so the slice/pad/reshape chains fuse into one pass.
    icp_fn = jax.jit(icp)
    result = jax.block_until_ready(icp_fn(preds, target))

    # pure-JAX reference check (same semantics as the torch/numpy module)
    ref = jnp.mean(
        ((target > preds[:, :, 0]) & (target < preds[:, :, -1])).astype(jnp.float32)
    )
    assert jnp.allclose(result, ref, atol=1e-6), (result, ref)

    print("KERNEL_OK")
</pallas_src>

<mosaic_0001>
module attributes {stable_mosaic.version = 11 : i64} {
  func.func @kernel(%arg0: i32, %arg1: memref<8x128xf32, #tpu.memory_space<vmem>>, %arg2: memref<8x128xf32, #tpu.memory_space<vmem>>, %arg3: memref<8x128xf32, #tpu.memory_space<vmem>>, %arg4: memref<8x128xi32, #tpu.memory_space<vmem>>) attributes {dimension_semantics = [#tpu.dimension_semantics<parallel>], iteration_bounds = array<i64: 1>, scalar_prefetch = 0 : i64, scratch_operands = 0 : i64, tpu.core_type = #tpu.core_type<tc>, window_params = [{transform_indices = @transform_0, window_bounds = array<i64: 8, 128>}, {transform_indices = @transform_1, window_bounds = array<i64: 8, 128>}, {transform_indices = @transform_2, window_bounds = array<i64: 8, 128>}, {transform_indices = @transform_3, window_bounds = array<i64: 8, 128>}]} {
    %c8_i32 = arith.constant 8 : i32
    %0 = arith.muli %arg0, %c8_i32 : i32
    %1 = tpu.iota {dimensions = array<i32: 0>} : vector<8x128xi32>
    %c0_i32 = arith.constant 0 : i32
    %2 = vector.broadcast %c0_i32 : i32 to vector<8x128xi32>
    %c0_i32_0 = arith.constant 0 : i32
    %c8_i32_1 = arith.constant 8 : i32
    %3 = arith.muli %c0_i32_0, %c8_i32_1 : i32
    %4 = tpu.assume_multiple %3, 8 : i32
    %5 = arith.index_cast %4 : i32 to index
    %c0 = arith.constant 0 : index
    %6 = vector.load %arg1[%5, %c0] : memref<8x128xf32, #tpu.memory_space<vmem>>, vector<8x128xf32>
    %7 = arith.index_cast %4 : i32 to index
    %c0_2 = arith.constant 0 : index
    %8 = vector.load %arg2[%7, %c0_2] : memref<8x128xf32, #tpu.memory_space<vmem>>, vector<8x128xf32>
    %9 = arith.index_cast %4 : i32 to index
    %c0_3 = arith.constant 0 : index
    %10 = vector.load %arg3[%9, %c0_3] : memref<8x128xf32, #tpu.memory_space<vmem>>, vector<8x128xf32>
    %11 = arith.cmpf ogt, %10, %6 : vector<8x128xf32>
    %12 = arith.cmpf olt, %10, %8 : vector<8x128xf32>
    %13 = arith.andi %11, %12 : vector<8x128xi1>
    %14 = arith.addi %0, %4 : i32
    %15 = vector.broadcast %14 : i32 to vector<8x128xi32>
    %16 = arith.addi %15, %1 : vector<8x128xi32>
    %c8_i32_4 = arith.constant 8 : i32
    %17 = vector.broadcast %c8_i32_4 : i32 to vector<8x128xi32>
    %18 = arith.cmpi slt, %16, %17 : vector<8x128xi32>
    %19 = arith.andi %13, %18 : vector<8x128xi1>
    %20 = arith.extui %19 : vector<8x128xi1> to vector<8x128xi32>
    %21 = vector.shape_cast %20 : vector<8x128xi32> to vector<1x8x128xi32>
    %cst = arith.constant dense<0> : vector<8x128xi32>
    %22 = vector.multi_reduction <add>, %21, %cst [0] : vector<1x8x128xi32> to vector<8x128xi32>
    %23 = arith.addi %2, %22 : vector<8x128xi32>
    %c1_i32 = arith.constant 1 : i32
    %c0_5 = arith.constant 0 : index
    %c0_6 = arith.constant 0 : index
    %24 = vector.load %arg4[%c0_5, %c0_6] : memref<8x128xi32, #tpu.memory_space<vmem>>, vector<8x128xi32>
    tpu.vector_store %arg4[%c0_5, %c0_6], %23 {strides = array<i32>} : memref<8x128xi32, #tpu.memory_space<vmem>>, vector<8x128xi32>,
    return
  }
  func.func @transform_0(%arg0: i32) -> (i32, i32) {
    %c0_i32 = arith.constant 0 : i32
    %c0_i32_0 = arith.constant 0 : i32
    return %arg0, %c0_i32 : i32, i32
  }
  func.func @transform_1(%arg0: i32) -> (i32, i32) {
    %c0_i32 = arith.constant 0 : i32
    %c0_i32_0 = arith.constant 0 : i32
    return %arg0, %c0_i32 : i32, i32
  }
  func.func @transform_2(%arg0: i32) -> (i32, i32) {
    %c0_i32 = arith.constant 0 : i32
    %c0_i32_0 = arith.constant 0 : i32
    return %arg0, %c0_i32 : i32, i32
  }
  func.func @transform_3(%arg0: i32) -> (i32, i32) {
    %c0_i32 = arith.constant 0 : i32
    %c0_i32_0 = arith.constant 0 : i32
    return %arg0, %c0_i32 : i32, i32
  }
}

</mosaic_0001>

<bundles_post_ra>
// kernel: icp.1
= control target key start
LH: loop header
LB: loop body
LE: loop exit
PB: predicated region body
PF: predicated region fallthrough
CT: control target
= control target key end

     0   :  { %v35_v3 = vmov 0   ;;  %s68_s0 = inlined_call_operand.vmem [shape: f32[8,128], index: 0, kind: input, shape index: {}]   ;;  %s69_s1 = inlined_call_operand.vmem [shape: f32[8,128], index: 1, kind: input, shape index: {}]   ;;  %s70_s2 = inlined_call_operand.vmem [shape: f32[8,128], index: 2, kind: input, shape index: {}]   ;;  %s71_s3 = inlined_call_operand.vmem [shape: s32[8,128], index: 3, kind: output, shape index: {}]  }
   0x1   :  { %v17_v0 = vld [vmem:[%s68_s0] sm:$0xff] }
   0x2   :  { %v18_v1 = vld [vmem:[%s69_s1] sm:$0xff] }
   0x3   :  { %v19_v2 = vld [vmem:[%s70_s2] sm:$0xff] }
   0x4   :  { %vm20_vm0 = vcmp.gt.f32.partialorder %v19_v2, %v17_v0  ;;  %vm21_vm1 = vcmp.lt.f32.partialorder %v19_v2, %v18_v1 }
   0x5   :  { %vm22_vm2 = vmand %vm20_vm0, %vm21_vm1 }
   0x6   :  { %v28_v4 = vsel %vm22_vm2, 1, %v35_v3 }
   0x7   :  { %29 = vst [vmem:[%s71_s3] sm:$0xff] %v28_v4 }

</bundles_post_ra>
